<compile_context>
chip_gen: v7x
topology: tpu7x:2x2x1
jax: 0.10.0
libtpu: 0.0.40
codegen_flags: <defaults>
</compile_context>

<pallas_src>
import functools
import math

import jax
import jax.numpy as jnp
from jax.experimental import pallas as pl
from jax.experimental.pallas import tpu as pltpu


def _fmod(x, y):
    """torch.fmod semantics (result sign follows x)."""
    return x - jnp.trunc(x / y) * y


def phased_conv_lstm_kernel(x_ref, state_ref, w_ref, mask_ref, ptt_ref, out_ref,
                            stack_ref, *, W, c_pad, leak, ratio_on):
    """One grid step = one batch image (lane-dense layout, L = H*W lanes).

    x_ref     : (c_tot_pad, L)  stacked [input ; prev_hidden(=c0)], zero-padded channels
    state_ref : (2*c_pad, L)    [prev_cell(=h0) ; prev_hidden(=c0)], zero-padded rows
    w_ref     : (4*c_pad, K)    conv weights, K = 9*c_tot_pad + 8; bias in col 9*c_tot_pad
    mask_ref  : (9*c_tot_pad, L) f32 0/1 boundary masks, one row-block per conv tap
    ptt_ref   : (3*c_pad, L)    [phase ; 1/tau ; times]
    out_ref   : (3*c_pad, L)    [h_t(=cell) ; c_s ; h_s]
    stack_ref : (K, L) VMEM scratch — K-stacked shifted activations + ones block
    """
    x = x_ref[...]                          # (c_tot_pad, L) f32
    ctp, L = x.shape

    # ---- build the K-stack: 9 shifted + masked copies, then the bias ones block ----
    for kh in range(3):
        for kw in range(3):
            tap = kh * 3 + kw
            dh, dw = kh - 1, kw - 1
            if dh == 0 and dw == 0:
                xs = x
            else:
                # out[p] needs in[p + dh*W + dw]  ==  roll(in, -(dh*W+dw))
                shift = (-(dh * W + dw)) % L
                xs = pltpu.roll(x, shift=shift, axis=1)
            # precomputed 0/1 mask zeroes neighbours that fall outside the image
            stack_ref[tap * ctp:(tap + 1) * ctp, :] = xs * mask_ref[tap * ctp:(tap + 1) * ctp, :]
    ones_off = 9 * ctp
    stack_ref[ones_off:ones_off + 8, :] = jnp.ones((8, L), jnp.float32)

    # ---- single fused MXU matmul (bias folded in via the ones block) ----
    gates = jnp.dot(w_ref[...], stack_ref[...], preferred_element_type=jnp.float32)

    # ---- ConvLSTM gate math on 8-sublane-aligned (c_pad, L) blocks ----
    def sig(v):                              # sigmoid via EUP tanh — no f32 divide
        return 0.5 * (jnp.tanh(0.5 * v) + 1.0)

    i_g = sig(gates[0 * c_pad:1 * c_pad])
    r_g = sig(gates[1 * c_pad:2 * c_pad])
    o_g = sig(gates[2 * c_pad:3 * c_pad])
    g_g = jnp.tanh(gates[3 * c_pad:4 * c_pad])

    h0 = state_ref[0 * c_pad:1 * c_pad, :]   # prev_cell
    c0 = state_ref[1 * c_pad:2 * c_pad, :]   # prev_hidden

    cell = r_g * h0 + i_g * g_g
    hidden = o_g * jnp.tanh(cell)

    # ---- PhasedLSTM time gate k (divide-free) ----
    phase = ptt_ref[0 * c_pad:1 * c_pad, :]
    inv_tau = ptt_ref[1 * c_pad:2 * c_pad, :]
    t = ptt_ref[2 * c_pad:3 * c_pad, :]
    q = (t - phase) * inv_tau
    phi = jnp.abs(q - jnp.trunc(q))          # == |fmod(t-phase, tau)| / tau
    k_up = (2.0 / ratio_on) * phi
    k_down = 2.0 - k_up
    k_closed = leak * phi
    k = jnp.where(phi < ratio_on, k_down, k_closed)
    k = jnp.where(phi < 0.5 * ratio_on, k_up, k)
    one_m_k = 1.0 - k

    # PyTorch wiring quirk preserved: the module returns h_t = ConvLSTM *cell*,
    # c_s blends cell with h0 (prev_cell), h_s blends hidden with c0 (prev_hidden).
    out_ref[0 * c_pad:1 * c_pad, :] = cell
    out_ref[1 * c_pad:2 * c_pad, :] = k * cell + one_m_k * h0
    out_ref[2 * c_pad:3 * c_pad, :] = k * hidden + one_m_k * c0


def phased_conv_lstm_cell(x, times, w, b, phase, tau, prev_state=None,
                          *, leak=0.001, ratio_on=0.1):
    """JAX/Pallas equivalent of PhasedConvLSTMCell.forward.

    x: (B, Cin, H, W) f32;  times: (B,);  w: (4*Ch, Cin+Ch, 3, 3);  b: (4*Ch,)
    phase, tau: (Ch*H*W,);  prev_state: optional (c0, h0) each (B, Ch, H, W).
    Returns (h_t, (c_s, h_s)).
    """
    B, Cin, H, W = x.shape
    n_gates = w.shape[0]
    c_hid = n_gates // 4
    c_tot = Cin + c_hid
    HW = H * W
    Ltot = B * HW
    f32 = jnp.float32

    c_pad = ((c_hid + 7) // 8) * 8           # sublane-aligned hidden block
    c_tot_pad = ((c_tot + 7) // 8) * 8       # sublane-aligned conv-input block
    K = 9 * c_tot_pad + 8                    # 9 taps + bias/ones block

    if prev_state is None:
        c0 = jnp.zeros((B, c_hid, H, W), x.dtype)
        h0 = jnp.zeros((B, c_hid, H, W), x.dtype)
    else:
        c0, h0 = prev_state

    # ---- layout plumbing (wrapper only): lane-dense (channels, batch*H*W) ----
    def to_k(a, rows_pad):                   # (B, C, H, W) -> (rows_pad, B*H*W)
        C = a.shape[1]
        a = a.astype(f32).transpose(1, 0, 2, 3).reshape(C, Ltot)
        return jnp.pad(a, ((0, rows_pad - C), (0, 0)))

    xk = to_k(jnp.concatenate([x, c0], axis=1), c_tot_pad)      # conv stacks (input, prev_hidden=c0)
    statek = jnp.concatenate([to_k(h0, c_pad), to_k(c0, c_pad)], axis=0)  # [prev_cell ; prev_hidden]

    # Conv weights -> (4*c_pad, K): column tap*c_tot_pad + ci holds w[o, ci, kh, kw],
    # bias in column 9*c_tot_pad; gate blocks padded to c_pad rows (tile-aligned slices).
    w9 = jnp.transpose(w.astype(f32), (0, 2, 3, 1)).reshape(n_gates, 9, c_tot)
    w9 = jnp.pad(w9, ((0, 0), (0, 0), (0, c_tot_pad - c_tot))).reshape(n_gates, 9 * c_tot_pad)
    bias_cols = jnp.pad(b.astype(f32).reshape(n_gates, 1), ((0, 0), (0, 7)))
    wk = jnp.concatenate([w9, bias_cols], axis=1).reshape(4, c_hid, K)
    wk = jnp.pad(wk, ((0, 0), (0, c_pad - c_hid), (0, 0))).reshape(4 * c_pad, K)

    # Lane tiling: one grid step per batch image when H*W is lane-aligned, else one step.
    if HW % 128 == 0:
        TL, GB = HW, B
    else:
        TL, GB = Ltot, 1

    # Precomputed f32 boundary masks, one (c_tot_pad, HW) block per conv tap.
    pvec = jnp.arange(HW, dtype=jnp.int32)
    hh, ww = pvec // W, pvec % W
    mrows = []
    for kh in range(3):
        for kw in range(3):
            dh, dw = kh - 1, kw - 1
            m = ((hh + dh >= 0) & (hh + dh < H) &
                 (ww + dw >= 0) & (ww + dw < W)).astype(f32)
            mrows.append(jnp.broadcast_to(m[None, :], (c_tot_pad, HW)))
    maskk = jnp.concatenate(mrows, axis=0)                       # (9*c_tot_pad, HW)
    if TL != HW:
        maskk = jnp.tile(maskk, (1, TL // HW))

    # [phase ; 1/tau ; times] slab (rows = hidden channels, cols = (batch, h, w)).
    def hid_slab(a_cbh):                    # (c_hid, B, HW) -> (c_pad, B*HW)
        return jnp.pad(a_cbh.reshape(c_hid, Ltot), ((0, c_pad - c_hid), (0, 0)))

    ph = jnp.broadcast_to(phase.astype(f32).reshape(c_hid, 1, HW), (c_hid, B, HW))
    itau = jnp.broadcast_to((1.0 / tau.astype(f32)).reshape(c_hid, 1, HW), (c_hid, B, HW))
    tt = jnp.broadcast_to(times.astype(f32).reshape(1, B, 1), (c_hid, B, HW))
    pttk = jnp.concatenate([hid_slab(ph), hid_slab(itau), hid_slab(tt)], axis=0)

    kernel = functools.partial(phased_conv_lstm_kernel, W=W, c_pad=c_pad,
                               leak=leak, ratio_on=ratio_on)

    # TODO(synk): for large C/H/W, tile TL further (multiples of 128), set
    # pltpu.CompilerParams(vmem_limit_bytes=...) for v7x's 64 MiB VMEM, and consider
    # bf16 MXU feed; at this size one per-batch step fits easily in f32.
    out = pl.pallas_call(
        kernel,
        out_shape=jax.ShapeDtypeStruct((3 * c_pad, Ltot), f32),
        grid=(GB,),
        in_specs=[
            pl.BlockSpec((c_tot_pad, TL), lambda i: (0, i)),      # stacked activations
            pl.BlockSpec((2 * c_pad, TL), lambda i: (0, i)),      # [h0 ; c0]
            pl.BlockSpec((4 * c_pad, K), lambda i: (0, 0)),       # conv weights (+bias)
            pl.BlockSpec((9 * c_tot_pad, TL), lambda i: (0, 0)),  # boundary masks
            pl.BlockSpec((3 * c_pad, TL), lambda i: (0, i)),      # [phase ; 1/tau ; t]
        ],
        out_specs=pl.BlockSpec((3 * c_pad, TL), lambda i: (0, i)),
        scratch_shapes=[pltpu.VMEM((K, TL), f32)],
        compiler_params=pltpu.CompilerParams(dimension_semantics=("parallel",)),
    )(xk, statek, wk, maskk, pttk)

    def from_k(a):                          # (c_hid, B*H*W) -> (B, c_hid, H, W)
        return a.reshape(c_hid, B, H, W).transpose(1, 0, 2, 3)

    h_t = from_k(out[0:c_hid])
    c_s = from_k(out[c_pad:c_pad + c_hid])
    h_s = from_k(out[2 * c_pad:2 * c_pad + c_hid])
    return h_t, (c_s, h_s)


def phased_conv_lstm_ref(x, times, w, b, phase, tau, prev_state=None,
                         *, leak=0.001, ratio_on=0.1):
    """Pure-JAX reference matching PhasedConvLSTMCell.forward (including its wiring)."""
    B, Cin, H, W = x.shape
    c_hid = w.shape[0] // 4
    if prev_state is None:
        c0 = jnp.zeros((B, c_hid, H, W), x.dtype)
        h0 = jnp.zeros((B, c_hid, H, W), x.dtype)
    else:
        c0, h0 = prev_state

    stacked = jnp.concatenate([x, c0], axis=1)        # prev_hidden = c0
    gates = jax.lax.conv_general_dilated(
        stacked, w, (1, 1), "SAME",
        dimension_numbers=("NCHW", "OIHW", "NCHW"),
        precision=jax.lax.Precision.HIGHEST) + b[None, :, None, None]
    i_g, r_g, o_g, g_g = jnp.split(gates, 4, axis=1)
    i_g = jax.nn.sigmoid(i_g)
    r_g = jax.nn.sigmoid(r_g)
    o_g = jax.nn.sigmoid(o_g)
    g_g = jnp.tanh(g_g)
    cell = r_g * h0 + i_g * g_g                       # prev_cell = h0
    hidden = o_g * jnp.tanh(cell)

    phi = jnp.abs(_fmod(times[:, None] - phase[None, :], tau[None, :])) / tau[None, :]
    k_up = 2.0 * phi / ratio_on
    k_down = 2.0 - k_up
    k_closed = leak * phi
    k = jnp.where(phi < ratio_on, k_down, k_closed)
    k = jnp.where(phi < 0.5 * ratio_on, k_up, k)

    cell_f, hidden_f = cell.reshape(B, -1), hidden.reshape(B, -1)
    c0_f, h0_f = c0.reshape(B, -1), h0.reshape(B, -1)
    c_s = (k * cell_f + (1.0 - k) * h0_f).reshape(B, c_hid, H, W)
    h_s = (k * hidden_f + (1.0 - k) * c0_f).reshape(B, c_hid, H, W)
    return cell, (c_s, h_s)               # module returns h_t = ConvLSTM cell output


if __name__ == "__main__":
    B, Cin, Chid, H, W = 2, 4, 4, 16, 16

    key = jax.random.PRNGKey(0)
    kx, kt, kw_, kb_, ktau, kph, kc0, kh0 = jax.random.split(key, 8)

    x = jax.random.normal(kx, (B, Cin, H, W), dtype=jnp.float32)
    times = jax.random.uniform(kt, (B,), jnp.float32, 0.5, 5.0)

    c_tot = Cin + Chid
    bound = 1.0 / math.sqrt(c_tot * 9)                # nn.Conv2d default init scale
    w = jax.random.uniform(kw_, (4 * Chid, c_tot, 3, 3), jnp.float32, -bound, bound)
    b = jax.random.uniform(kb_, (4 * Chid,), jnp.float32, -bound, bound)

    hidden_size = Chid * H * W
    tau = jnp.exp(jax.random.uniform(ktau, (hidden_size,), jnp.float32,
                                     math.log(0.02), math.log(50.0)))
    phase = jax.random.uniform(kph, (hidden_size,), jnp.float32, 0.0, 1.0) * tau

    # Non-zero previous state to exercise the full data path.
    c0 = 0.1 * jax.random.normal(kc0, (B, Chid, H, W), dtype=jnp.float32)
    h0 = 0.1 * jax.random.normal(kh0, (B, Chid, H, W), dtype=jnp.float32)

    h_t, (c_s, h_s) = jax.block_until_ready(
        phased_conv_lstm_cell(x, times, w, b, phase, tau, prev_state=(c0, h0)))
    rh_t, (rc_s, rh_s) = jax.block_until_ready(
        phased_conv_lstm_ref(x, times, w, b, phase, tau, prev_state=(c0, h0)))

    assert h_t.shape == (B, Chid, H, W) and h_t.dtype == jnp.float32
    # atol slack covers fmod knife-edge wraps (k jumps by `leak`), the 1/tau reciprocal
    # path, and MXU reduction-order differences vs lax.conv.
    for got, want, name in ((h_t, rh_t, "h_t"), (c_s, rc_s, "c_s"), (h_s, rh_s, "h_s")):
        assert jnp.allclose(got, want, rtol=1e-3, atol=2e-3), f"mismatch vs reference: {name}"

    # TODO(synk): backward pass (incl. the _mod straight-through-gradient trick) is not
    # implemented; this kernel covers the forward semantics only.
    print("KERNEL_OK")
</pallas_src>

<mosaic_0001>
module attributes {stable_mosaic.version = 11 : i64} {
  func.func @phased_conv_lstm_kernel(%arg0: i32, %arg1: memref<8x256xf32, #tpu.memory_space<vmem>>, %arg2: memref<16x256xf32, #tpu.memory_space<vmem>>, %arg3: memref<32x80xf32, #tpu.memory_space<vmem>>, %arg4: memref<72x256xf32, #tpu.memory_space<vmem>>, %arg5: memref<24x256xf32, #tpu.memory_space<vmem>>, %arg6: memref<24x256xf32, #tpu.memory_space<vmem>>, %arg7: memref<80x256xf32, #tpu.memory_space<vmem>>) attributes {dimension_semantics = [#tpu.dimension_semantics<parallel>], iteration_bounds = array<i64: 2>, scalar_prefetch = 0 : i64, scratch_operands = 1 : i64, tpu.core_type = #tpu.core_type<tc>, window_params = [{transform_indices = @transform_0, window_bounds = array<i64: 8, 256>}, {transform_indices = @transform_1, window_bounds = array<i64: 16, 256>}, {pipeline_mode = #tpu.pipeline_mode<synchronous>, transform_indices = @transform_2, window_bounds = array<i64: 32, 80>}, {pipeline_mode = #tpu.pipeline_mode<synchronous>, transform_indices = @transform_3, window_bounds = array<i64: 72, 256>}, {transform_indices = @transform_4, window_bounds = array<i64: 24, 256>}, {transform_indices = @transform_5, window_bounds = array<i64: 24, 256>}]} {
    %c0 = arith.constant 0 : index
    %c0_0 = arith.constant 0 : index
    %0 = vector.load %arg1[%c0, %c0_0] : memref<8x256xf32, #tpu.memory_space<vmem>>, vector<8x256xf32>
    %c17_i32 = arith.constant 17 : i32
    %1 = tpu.dynamic_rotate %0 by %c17_i32 dim 1 : vector<8x256xf32>, i32 -> vector<8x256xf32>
    %c0_1 = arith.constant 0 : index
    %c0_2 = arith.constant 0 : index
    %2 = vector.load %arg4[%c0_1, %c0_2] : memref<72x256xf32, #tpu.memory_space<vmem>>, vector<8x256xf32>
    %3 = arith.mulf %1, %2 : vector<8x256xf32>
    %c0_3 = arith.constant 0 : index
    %c0_4 = arith.constant 0 : index
    %4 = vector.load %arg7[%c0_3, %c0_4] : memref<80x256xf32, #tpu.memory_space<vmem>>, vector<8x256xf32>
    tpu.vector_store %arg7[%c0_3, %c0_4], %3 {strides = array<i32>} : memref<80x256xf32, #tpu.memory_space<vmem>>, vector<8x256xf32>,
    %c16_i32 = arith.constant 16 : i32
    %5 = tpu.dynamic_rotate %0 by %c16_i32 dim 1 : vector<8x256xf32>, i32 -> vector<8x256xf32>
    %c8 = arith.constant 8 : index
    %c0_5 = arith.constant 0 : index
    %6 = vector.load %arg4[%c8, %c0_5] : memref<72x256xf32, #tpu.memory_space<vmem>>, vector<8x256xf32>
    %7 = arith.mulf %5, %6 : vector<8x256xf32>
    %c8_6 = arith.constant 8 : index
    %c0_7 = arith.constant 0 : index
    %8 = vector.load %arg7[%c8_6, %c0_7] : memref<80x256xf32, #tpu.memory_space<vmem>>, vector<8x256xf32>
    tpu.vector_store %arg7[%c8_6, %c0_7], %7 {strides = array<i32>} : memref<80x256xf32, #tpu.memory_space<vmem>>, vector<8x256xf32>,
    %c15_i32 = arith.constant 15 : i32
    %9 = tpu.dynamic_rotate %0 by %c15_i32 dim 1 : vector<8x256xf32>, i32 -> vector<8x256xf32>
    %c16 = arith.constant 16 : index
    %c0_8 = arith.constant 0 : index
    %10 = vector.load %arg4[%c16, %c0_8] : memref<72x256xf32, #tpu.memory_space<vmem>>, vector<8x256xf32>
    %11 = arith.mulf %9, %10 : vector<8x256xf32>
    %c16_9 = arith.constant 16 : index
    %c0_10 = arith.constant 0 : index
    %12 = vector.load %arg7[%c16_9, %c0_10] : memref<80x256xf32, #tpu.memory_space<vmem>>, vector<8x256xf32>
    tpu.vector_store %arg7[%c16_9, %c0_10], %11 {strides = array<i32>} : memref<80x256xf32, #tpu.memory_space<vmem>>, vector<8x256xf32>,
    %c1_i32 = arith.constant 1 : i32
    %13 = tpu.dynamic_rotate %0 by %c1_i32 dim 1 : vector<8x256xf32>, i32 -> vector<8x256xf32>
    %c24 = arith.constant 24 : index
    %c0_11 = arith.constant 0 : index
    %14 = vector.load %arg4[%c24, %c0_11] : memref<72x256xf32, #tpu.memory_space<vmem>>, vector<8x256xf32>
    %15 = arith.mulf %13, %14 : vector<8x256xf32>
    %c24_12 = arith.constant 24 : index
    %c0_13 = arith.constant 0 : index
    %16 = vector.load %arg7[%c24_12, %c0_13] : memref<80x256xf32, #tpu.memory_space<vmem>>, vector<8x256xf32>
    tpu.vector_store %arg7[%c24_12, %c0_13], %15 {strides = array<i32>} : memref<80x256xf32, #tpu.memory_space<vmem>>, vector<8x256xf32>,
    %c32 = arith.constant 32 : index
    %c0_14 = arith.constant 0 : index
    %17 = vector.load %arg4[%c32, %c0_14] : memref<72x256xf32, #tpu.memory_space<vmem>>, vector<8x256xf32>
    %18 = arith.mulf %0, %17 : vector<8x256xf32>
    %c32_15 = arith.constant 32 : index
    %c0_16 = arith.constant 0 : index
    %19 = vector.load %arg7[%c32_15, %c0_16] : memref<80x256xf32, #tpu.memory_space<vmem>>, vector<8x256xf32>
    tpu.vector_store %arg7[%c32_15, %c0_16], %18 {strides = array<i32>} : memref<80x256xf32, #tpu.memory_space<vmem>>, vector<8x256xf32>,
    %c255_i32 = arith.constant 255 : i32
    %20 = tpu.dynamic_rotate %0 by %c255_i32 dim 1 : vector<8x256xf32>, i32 -> vector<8x256xf32>
    %c40 = arith.constant 40 : index
    %c0_17 = arith.constant 0 : index
    %21 = vector.load %arg4[%c40, %c0_17] : memref<72x256xf32, #tpu.memory_space<vmem>>, vector<8x256xf32>
    %22 = arith.mulf %20, %21 : vector<8x256xf32>
    %c40_18 = arith.constant 40 : index
    %c0_19 = arith.constant 0 : index
    %23 = vector.load %arg7[%c40_18, %c0_19] : memref<80x256xf32, #tpu.memory_space<vmem>>, vector<8x256xf32>
    tpu.vector_store %arg7[%c40_18, %c0_19], %22 {strides = array<i32>} : memref<80x256xf32, #tpu.memory_space<vmem>>, vector<8x256xf32>,
    %c241_i32 = arith.constant 241 : i32
    %24 = tpu.dynamic_rotate %0 by %c241_i32 dim 1 : vector<8x256xf32>, i32 -> vector<8x256xf32>
    %c48 = arith.constant 48 : index
    %c0_20 = arith.constant 0 : index
    %25 = vector.load %arg4[%c48, %c0_20] : memref<72x256xf32, #tpu.memory_space<vmem>>, vector<8x256xf32>
    %26 = arith.mulf %24, %25 : vector<8x256xf32>
    %c48_21 = arith.constant 48 : index
    %c0_22 = arith.constant 0 : index
    %27 = vector.load %arg7[%c48_21, %c0_22] : memref<80x256xf32, #tpu.memory_space<vmem>>, vector<8x256xf32>
    tpu.vector_store %arg7[%c48_21, %c0_22], %26 {strides = array<i32>} : memref<80x256xf32, #tpu.memory_space<vmem>>, vector<8x256xf32>,
    %c240_i32 = arith.constant 240 : i32
    %28 = tpu.dynamic_rotate %0 by %c240_i32 dim 1 : vector<8x256xf32>, i32 -> vector<8x256xf32>
    %c56 = arith.constant 56 : index
    %c0_23 = arith.constant 0 : index
    %29 = vector.load %arg4[%c56, %c0_23] : memref<72x256xf32, #tpu.memory_space<vmem>>, vector<8x256xf32>
    %30 = arith.mulf %28, %29 : vector<8x256xf32>
    %c56_24 = arith.constant 56 : index
    %c0_25 = arith.constant 0 : index
    %31 = vector.load %arg7[%c56_24, %c0_25] : memref<80x256xf32, #tpu.memory_space<vmem>>, vector<8x256xf32>
    tpu.vector_store %arg7[%c56_24, %c0_25], %30 {strides = array<i32>} : memref<80x256xf32, #tpu.memory_space<vmem>>, vector<8x256xf32>,
    %c239_i32 = arith.constant 239 : i32
    %32 = tpu.dynamic_rotate %0 by %c239_i32 dim 1 : vector<8x256xf32>, i32 -> vector<8x256xf32>
    %c64 = arith.constant 64 : index
    %c0_26 = arith.constant 0 : index
    %33 = vector.load %arg4[%c64, %c0_26] : memref<72x256xf32, #tpu.memory_space<vmem>>, vector<8x256xf32>
    %34 = arith.mulf %32, %33 : vector<8x256xf32>
    %c64_27 = arith.constant 64 : index
    %c0_28 = arith.constant 0 : index
    %35 = vector.load %arg7[%c64_27, %c0_28] : memref<80x256xf32, #tpu.memory_space<vmem>>, vector<8x256xf32>
    tpu.vector_store %arg7[%c64_27, %c0_28], %34 {strides = array<i32>} : memref<80x256xf32, #tpu.memory_space<vmem>>, vector<8x256xf32>,
    %cst = arith.constant 1.000000e+00 : f32
    %36 = vector.broadcast %cst : f32 to vector<8x256xf32>
    %c72 = arith.constant 72 : index
    %c0_29 = arith.constant 0 : index
    %37 = vector.load %arg7[%c72, %c0_29] : memref<80x256xf32, #tpu.memory_space<vmem>>, vector<8x256xf32>
    tpu.vector_store %arg7[%c72, %c0_29], %36 {strides = array<i32>} : memref<80x256xf32, #tpu.memory_space<vmem>>, vector<8x256xf32>,
    %c0_30 = arith.constant 0 : index
    %c0_31 = arith.constant 0 : index
    %38 = vector.load %arg3[%c0_30, %c0_31] : memref<32x80xf32, #tpu.memory_space<vmem>>, vector<32x80xf32>
    %c0_32 = arith.constant 0 : index
    %c0_33 = arith.constant 0 : index
    %39 = vector.load %arg7[%c0_32, %c0_33] : memref<80x256xf32, #tpu.memory_space<vmem>>, vector<80x256xf32>
    %cst_34 = arith.constant dense<0.000000e+00> : vector<32x256xf32>
    %40 = tpu.matmul %38, %39, %cst_34 {dimension_numbers = #tpu.dot_dimension_numbers<[1], [0], [0], [1], [0, 0, 1, 1], [], []>} : vector<32x80xf32>, vector<80x256xf32>, vector<32x256xf32> -> vector<32x256xf32>
    %41 = vector.extract_strided_slice %40 {offsets = [0, 0], sizes = [8, 256], strides = [1, 1]} : vector<32x256xf32> to vector<8x256xf32>
    %cst_35 = arith.constant 5.000000e-01 : f32
    %42 = vector.broadcast %cst_35 : f32 to vector<8x256xf32>
    %43 = arith.mulf %42, %41 : vector<8x256xf32>
    %44 = math.tanh %43 : vector<8x256xf32>
    %cst_36 = arith.constant 1.000000e+00 : f32
    %45 = vector.broadcast %cst_36 : f32 to vector<8x256xf32>
    %46 = arith.addf %44, %45 : vector<8x256xf32>
    %cst_37 = arith.constant 5.000000e-01 : f32
    %47 = vector.broadcast %cst_37 : f32 to vector<8x256xf32>
    %48 = arith.mulf %47, %46 : vector<8x256xf32>
    %49 = vector.extract_strided_slice %40 {offsets = [8, 0], sizes = [8, 256], strides = [1, 1]} : vector<32x256xf32> to vector<8x256xf32>
    %cst_38 = arith.constant 5.000000e-01 : f32
    %50 = vector.broadcast %cst_38 : f32 to vector<8x256xf32>
    %51 = arith.mulf %50, %49 : vector<8x256xf32>
    %52 = math.tanh %51 : vector<8x256xf32>
    %cst_39 = arith.constant 1.000000e+00 : f32
    %53 = vector.broadcast %cst_39 : f32 to vector<8x256xf32>
    %54 = arith.addf %52, %53 : vector<8x256xf32>
    %cst_40 = arith.constant 5.000000e-01 : f32
    %55 = vector.broadcast %cst_40 : f32 to vector<8x256xf32>
    %56 = arith.mulf %55, %54 : vector<8x256xf32>
    %57 = vector.extract_strided_slice %40 {offsets = [16, 0], sizes = [8, 256], strides = [1, 1]} : vector<32x256xf32> to vector<8x256xf32>
    %cst_41 = arith.constant 5.000000e-01 : f32
    %58 = vector.broadcast %cst_41 : f32 to vector<8x256xf32>
    %59 = arith.mulf %58, %57 : vector<8x256xf32>
    %60 = math.tanh %59 : vector<8x256xf32>
    %cst_42 = arith.constant 1.000000e+00 : f32
    %61 = vector.broadcast %cst_42 : f32 to vector<8x256xf32>
    %62 = arith.addf %60, %61 : vector<8x256xf32>
    %cst_43 = arith.constant 5.000000e-01 : f32
    %63 = vector.broadcast %cst_43 : f32 to vector<8x256xf32>
    %64 = arith.mulf %63, %62 : vector<8x256xf32>
    %65 = vector.extract_strided_slice %40 {offsets = [24, 0], sizes = [8, 256], strides = [1, 1]} : vector<32x256xf32> to vector<8x256xf32>
    %66 = math.tanh %65 : vector<8x256xf32>
    %c0_44 = arith.constant 0 : index
    %c0_45 = arith.constant 0 : index
    %67 = vector.load %arg2[%c0_44, %c0_45] : memref<16x256xf32, #tpu.memory_space<vmem>>, vector<8x256xf32>
    %c8_46 = arith.constant 8 : index
    %c0_47 = arith.constant 0 : index
    %68 = vector.load %arg2[%c8_46, %c0_47] : memref<16x256xf32, #tpu.memory_space<vmem>>, vector<8x256xf32>
    %69 = arith.mulf %56, %67 : vector<8x256xf32>
    %70 = arith.mulf %48, %66 : vector<8x256xf32>
    %71 = arith.addf %69, %70 : vector<8x256xf32>
    %72 = math.tanh %71 : vector<8x256xf32>
    %73 = arith.mulf %64, %72 : vector<8x256xf32>
    %c0_48 = arith.constant 0 : index
    %c0_49 = arith.constant 0 : index
    %74 = vector.load %arg5[%c0_48, %c0_49] : memref<24x256xf32, #tpu.memory_space<vmem>>, vector<8x256xf32>
    %c8_50 = arith.constant 8 : index
    %c0_51 = arith.constant 0 : index
    %75 = vector.load %arg5[%c8_50, %c0_51] : memref<24x256xf32, #tpu.memory_space<vmem>>, vector<8x256xf32>
    %c16_52 = arith.constant 16 : index
    %c0_53 = arith.constant 0 : index
    %76 = vector.load %arg5[%c16_52, %c0_53] : memref<24x256xf32, #tpu.memory_space<vmem>>, vector<8x256xf32>
    %77 = arith.subf %76, %74 : vector<8x256xf32>
    %78 = arith.mulf %77, %75 : vector<8x256xf32>
    %cst_54 = arith.constant 0.000000e+00 : f32
    %79 = vector.broadcast %cst_54 : f32 to vector<8x256xf32>
    %80 = arith.cmpf olt, %78, %79 : vector<8x256xf32>
    %81 = math.ceil %78 : vector<8x256xf32>
    %82 = math.floor %78 : vector<8x256xf32>
    %83 = arith.select %80, %81, %82 : vector<8x256xi1>, vector<8x256xf32>
    %84 = arith.subf %78, %83 : vector<8x256xf32>
    %85 = math.absf %84 : vector<8x256xf32>
    %cst_55 = arith.constant 2.000000e+01 : f32
    %86 = vector.broadcast %cst_55 : f32 to vector<8x256xf32>
    %87 = arith.mulf %86, %85 : vector<8x256xf32>
    %cst_56 = arith.constant 2.000000e+00 : f32
    %88 = vector.broadcast %cst_56 : f32 to vector<8x256xf32>
    %89 = arith.subf %88, %87 : vector<8x256xf32>
    %cst_57 = arith.constant 1.000000e-03 : f32
    %90 = vector.broadcast %cst_57 : f32 to vector<8x256xf32>
    %91 = arith.mulf %90, %85 : vector<8x256xf32>
    %cst_58 = arith.constant 1.000000e-01 : f32
    %92 = vector.broadcast %cst_58 : f32 to vector<8x256xf32>
    %93 = arith.cmpf olt, %85, %92 : vector<8x256xf32>
    %94 = arith.select %93, %89, %91 : vector<8x256xi1>, vector<8x256xf32>
    %cst_59 = arith.constant 5.000000e-02 : f32
    %95 = vector.broadcast %cst_59 : f32 to vector<8x256xf32>
    %96 = arith.cmpf olt, %85, %95 : vector<8x256xf32>
    %97 = arith.select %96, %87, %94 : vector<8x256xi1>, vector<8x256xf32>
    %cst_60 = arith.constant 1.000000e+00 : f32
    %98 = vector.broadcast %cst_60 : f32 to vector<8x256xf32>
    %99 = arith.subf %98, %97 : vector<8x256xf32>
    %c0_61 = arith.constant 0 : index
    %c0_62 = arith.constant 0 : index
    %100 = vector.load %arg6[%c0_61, %c0_62] : memref<24x256xf32, #tpu.memory_space<vmem>>, vector<8x256xf32>
    tpu.vector_store %arg6[%c0_61, %c0_62], %71 {strides = array<i32>} : memref<24x256xf32, #tpu.memory_space<vmem>>, vector<8x256xf32>,
    %101 = arith.mulf %97, %71 : vector<8x256xf32>
    %102 = arith.mulf %99, %67 : vector<8x256xf32>
    %103 = arith.addf %101, %102 : vector<8x256xf32>
    %c8_63 = arith.constant 8 : index
    %c0_64 = arith.constant 0 : index
    %104 = vector.load %arg6[%c8_63, %c0_64] : memref<24x256xf32, #tpu.memory_space<vmem>>, vector<8x256xf32>
    tpu.vector_store %arg6[%c8_63, %c0_64], %103 {strides = array<i32>} : memref<24x256xf32, #tpu.memory_space<vmem>>, vector<8x256xf32>,
    %105 = arith.mulf %97, %73 : vector<8x256xf32>
    %106 = arith.mulf %99, %68 : vector<8x256xf32>
    %107 = arith.addf %105, %106 : vector<8x256xf32>
    %c16_65 = arith.constant 16 : index
    %c0_66 = arith.constant 0 : index
    %108 = vector.load %arg6[%c16_65, %c0_66] : memref<24x256xf32, #tpu.memory_space<vmem>>, vector<8x256xf32>
    tpu.vector_store %arg6[%c16_65, %c0_66], %107 {strides = array<i32>} : memref<24x256xf32, #tpu.memory_space<vmem>>, vector<8x256xf32>,
    return
  }
  func.func @transform_0(%arg0: i32) -> (i32, i32) {
    %c0_i32 = arith.constant 0 : i32
    %c0_i32_0 = arith.constant 0 : i32
    return %c0_i32, %arg0 : i32, i32
  }
  func.func @transform_1(%arg0: i32) -> (i32, i32) {
    %c0_i32 = arith.constant 0 : i32
    %c0_i32_0 = arith.constant 0 : i32
    return %c0_i32, %arg0 : i32, i32
  }
  func.func @transform_2(%arg0: i32) -> (i32, i32) {
    %c0_i32 = arith.constant 0 : i32
    %c0_i32_0 = arith.constant 0 : i32
    %c0_i32_1 = arith.constant 0 : i32
    return %c0_i32, %c0_i32_0 : i32, i32
  }
  func.func @transform_3(%arg0: i32) -> (i32, i32) {
    %c0_i32 = arith.constant 0 : i32
    %c0_i32_0 = arith.constant 0 : i32
    %c0_i32_1 = arith.constant 0 : i32
    return %c0_i32, %c0_i32_0 : i32, i32
  }
  func.func @transform_4(%arg0: i32) -> (i32, i32) {
    %c0_i32 = arith.constant 0 : i32
    %c0_i32_0 = arith.constant 0 : i32
    return %c0_i32, %arg0 : i32, i32
  }
  func.func @transform_5(%arg0: i32) -> (i32, i32) {
    %c0_i32 = arith.constant 0 : i32
    %c0_i32_0 = arith.constant 0 : i32
    return %c0_i32, %arg0 : i32, i32
  }
}

</mosaic_0001>

<bundles_post_ra>
// kernel: tpu_custom_call.1
= control target key start
LH: loop header
LB: loop body
LE: loop exit
PB: predicated region body
PF: predicated region fallthrough
CT: control target
= control target key end

     0   :  { %s1696_s0 = inlined_call_operand.hbm [shape: f32[8,512], index: 0, kind: input, shape index: {}]   ;;  %s1697_s1 = inlined_call_operand.hbm [shape: f32[16,512], index: 1, kind: input, shape index: {}]   ;;  %s1698_s2 = inlined_call_operand.hbm [shape: f32[32,80], index: 2, kind: input, shape index: {}]   ;;  %s1699_s3 = inlined_call_operand.hbm [shape: f32[72,256], index: 3, kind: input, shape index: {}]   ;;  %s1700_s4 = inlined_call_operand.hbm [shape: f32[24,512], index: 4, kind: input, shape index: {}]   ;;  %s1701_s5 = inlined_call_operand.hbm [shape: f32[24,512], index: 5, kind: output, shape index: {}]  }
   0x1   :  { %1719 = sst [smem:[#allocation24_spill]] %s1696_s0 }
   0x2   :  { %1720 = sst [smem:[#allocation25_spill]] %s1698_s2 }
   0x3   :  { %10 = vsyncpa [#allocation4], 0 }
   0x4   :  { %12 = vsyncpa [#allocation4 + $0x1], 0 }
   0x5   :  { %13 = vsyncpa [#allocation7], 0 }
   0x6   :  { %15 = vsyncpa [#allocation7 + $0x1], 0 }
   0x7   :  { %16 = vsyncpa [#allocation10], 0 }
   0x8   :  { %17 = vsyncpa [#allocation5], 0 }
   0x9   :  { %19 = vsyncpa [#allocation5 + $0x1], 0  ;;  %s1297_s18 = smov 0   ;;  %s1299_s19 = smov 0  }
   0xa   :  { %s1301_s20 = smov 0   ;;  %s1303_s21 = smov 0  }
   0xb LB: > { %1721 = sst [smem:[#allocation19_spill]] %s1230_s18  ;;  %s1318_s22 = sadd.s32 4294967295, %s1242_s21   ;;  %s1242_s21 = sphi %s1303_s21, %s1754_s21   ;;  %s1238_s20 = sphi %s1301_s20, %s1756_s20   ;;  %s1234_s19 = sphi %s1299_s19, %s1758_s19   ;;  %s1230_s18 = sphi %s1297_s18, %s1757_s18  }
   0xc   : > { %1722 = sst [smem:[#allocation20_spill]] %s1238_s20  ;;  %s838_s23 = sadd.s32 4294967294, %s1242_s21  }
   0xd   : > { %p45_p0 = scmp.ne.s32.totalorder %s1234_s19, %s1230_s18  ;;  %p1702_p1 = scmp.eq.s32.totalorder %s1318_s22, 0 }
   0xe   : > { %p169_p3 = scmp.eq.s32.totalorder %s838_s23, 1  ;;  %p839_p5 = scmp.ge.s32.totalorder %s1242_s21, 1 }
   0xf   : > { %p1327_p4 = por %p1702_p1, %p45_p0  ;;  %p176_p7 = scmp.lt.s32.totalorder %s1242_s21, 3 }
  0x10   : > { %p1332_p6 = por %p169_p3, %p45_p0  ;;  %s1244_s27 = smov [#allocation8]  }
  0x11   : > { %s1723_s24 = scalar_select %p1327_p4, 1, 0 }
  0x12   : > { %s1724_s25 = scalar_select %p1332_p6, 1, 0 }
  0x13   : > { %p1337_p8 = pnand %p839_p5, %p176_p7  ;;  %s188_s28 = sshll.u32 %s1244_s27, 4  ;;  %s1341_s28 = int_to_ptr.vmem [resolvable:$true] %s188_s28 }
  0x14   : > { %1725 = sst [smem:[#allocation21_spill]] %s1724_s25  ;;  %s1353_s30 = sadd.s32 1, %s1242_s21  }
  0x15   : > { %s1726_s26 = scalar_select %p1337_p8, 1, 0 }
  0x16   : > { %p916_p9 = pneg %p1337_p8  ;;  %1728 = sst [smem:[#allocation22_spill]] %s1353_s30 }
  0x17   : > { %s32_s6 = sadd.s32 1, %s1238_s20  ;;  %s29_s7 = ssub.s32 %s1242_s21, %s1353_s30 }
  0x18   : > { %p1348_p11 = pnand %p916_p9, %p1702_p1  ;;  %s1729_s2 = sld [smem:[#allocation25_spill]] }
  0x1a   : > { %s1727_s29 = scalar_select %p1348_p11, 1, 0 }
  0x1b   : > { %p1703_p13 = pneg %p1348_p11 }
  0x1e   : > { %s1014_s10 = scalar_lea.hbm %s1729_s2, 512 }
  0x1f   : > { %p1015_p12 = scmp.ne.s32.totalorder %s1729_s2, %s1014_s10  ;;  %p1021_p5 = scmp.lt.u32.totalorder %s1014_s10, %s1729_s2 }
  0x21   : > { %p1017_p0 = pnand %p1703_p13, %p1015_p12 }
  0x23   : > { %p1018_p3 = pneg %p1017_p0 }
  0x25   : > { %p1023_p7 = pnand %p1021_p5, %p1018_p3 }
  0x27   : > { %1026 = shalt.err (!%p1023_p7)
}
  0x28   : > { %s1027_s15 = scalar_lea.vmem %s1341_s28, 512  ;;  %p1035_p2 = scmp.lt.s32.totalorder %s1341_s28, %s1341_s28 }
  0x29   : > { %p1028_p9 = scmp.ne.s32.totalorder %s1341_s28, %s1027_s15  ;;  %p1036_p12 = scmp.lt.s32.totalorder %s1027_s15, %s1027_s15 }
  0x2b   : > { %p1030_p10 = pnand %p1028_p9, %p1703_p13  ;;  %p1037_p0 = por %p1036_p12, %p1035_p2 }
  0x2d   : > { %p1031_p1 = pneg %p1030_p10 }
  0x2f   : > { %p1038_p6 = pnand %p1037_p0, %p1031_p1 }
  0x31   : > { %1041 = shalt.err (!%p1038_p6)
}
  0x32   : > { %s1245_s16 = smov 128   ;;  %s1246_s17 = smov 8  }
  0x33   : > { %919 = dma.hbm_to_vmem [thread:$0]  (!%p1348_p11), %s1729_s2, 512, %s1341_s28, [#allocation7], %s1245_s16, %s1245_s16, %s1246_s17  }
  0x34   : > { %p30_p1 = scmp.eq.s32.totalorder %s29_s7, 0  ;;  %p39_p2 = scmp.ne.s32.totalorder %s1238_s20, %s1234_s19 }
  0x35   : > { %p40_p6 = scmp.eq.s32.totalorder %s1242_s21, 0  ;;  %p939_p10 = scmp.lt.s32.totalorder %s1242_s21, 2 }
  0x36   : > { %s1390_s8 = scalar_select %p30_p1, %s1238_s20, %s32_s6  }
  0x37   : > { %p41_p3 = por %p40_p6, %p39_p2  ;;  %p1731_p5 = scmp.eq.s32.totalorder %s1318_s22, 1 }
  0x38   : > { %1730 = sst [smem:[#allocation23_spill]] %s1390_s8  ;;  %s1705_s10 = sand.u32 1, %s1242_s21  }
  0x39   : > { %p1394_p7 = por %p1731_p5, %p39_p2  ;;  %s1400_s11 = sand.u32 1, %s1238_s20  }
  0x3a   : > { %s843_s12 = sshll.u32 %s1400_s11, 4  ;;  %s1404_s28 = sshll.u32 %s1242_s21, 8 }
  0x3b   : > { %s1732_s9 = scalar_select %p1394_p7, 1, 0 }
  0x3c   : > { %s1733_s0 = sld [smem:[#allocation24_spill]]  ;;  %s219_s14 = scalar_lea.vmem [#allocation3], %s843_s12 }
  0x3d   : > { %s227_s15 = sshll.u32 %s219_s14, 4  ;;  %p1414_p9 = pnand %p939_p10, %p41_p3  ;;  %s1412_s15 = int_to_ptr.vmem [resolvable:$true] %s227_s15 }
  0x3e   : > { %s1421_s23 = scalar_lea.sflag [#allocation4], %s1705_s10 }
  0x3f   : > { %s1734_s16 = scalar_select %p1414_p9, 1, 0 }
  0x40   : > { %p1427_p0 = pneg %p1414_p9 }
  0x42   : > { %s1410_s6 = scalar_lea.hbm %s1733_s0, %s1404_s28  ;;  %s1047_s14 = scalar_lea.hbm %s1733_s0, 512 }
  0x43   : > { %s1042_s27 = scalar_lea.hbm %s1410_s6, 256  ;;  %p1048_p6 = scmp.lt.u32.totalorder %s1410_s6, %s1733_s0 }
  0x44   : > { %p1043_p12 = scmp.ne.s32.totalorder %s1410_s6, %s1042_s27  ;;  %p1049_p10 = scmp.lt.u32.totalorder %s1047_s14, %s1042_s27 }
  0x45   : > { %s1735_s7 = scalar_select %p1427_p0, 1, 0 }
  0x46   : > { %p1045_p1 = pnand %p1427_p0, %p1043_p12  ;;  %p1050_p3 = por %p1049_p10, %p1048_p6 }
  0x47   : > { %p1051_p5 = scmp.lt.u32.totalorder %s1042_s27, %s1410_s6 }
  0x48   : > { %p1046_p2 = pneg %p1045_p1 }
  0x49   : > { %p1052_p13 = por %p1051_p5, %p1050_p3 }
  0x4b   : > { %p1053_p7 = pnand %p1052_p13, %p1046_p2 }
  0x4d   : > { %1056 = shalt.err (!%p1053_p7)
}
  0x4e   : > { %s1057_s10 = scalar_lea.vmem %s1412_s15, 256  ;;  %s1247_s12 = smov [#allocation3]  }
  0x4f   : > { %p1058_p12 = scmp.ne.s32.totalorder %s1412_s15, %s1057_s10  ;;  %s1062_s13 = sshll.u32 %s1247_s12, 4  ;;  %s1063_s13 = int_to_ptr.vmem [resolvable:$false] %s1062_s13 }
  0x50   : > { %s1064_s2 = scalar_lea.vmem %s1063_s13, 512  ;;  %p1065_p8 = scmp.lt.s32.totalorder %s1412_s15, %s1063_s13 }
  0x51   : > { %p1060_p1 = pnand %p1058_p12, %p1427_p0  ;;  %p1066_p11 = scmp.lt.s32.totalorder %s1064_s2, %s1057_s10 }
  0x53   : > { %p1061_p4 = pneg %p1060_p1  ;;  %p1067_p6 = por %p1066_p11, %p1065_p8 }
  0x55   : > { %p1068_p10 = pnand %p1067_p6, %p1061_p4 }
  0x57   : > { %1071 = shalt.err (!%p1068_p10)
}
  0x58   : > { %926 = dma.hbm_to_vmem [thread:$0]  (!%p1414_p9), %s1410_s6, 256, %s1412_s15, %s1421_s23  }
  0x59   : > { %s1455_s14 = scalar_lea.hbm %s1697_s1, %s1404_s28  ;;  %s1736_s10 = sshll.u32 %s1400_s11, 5 }
  0x5a   : > { %s238_s12 = scalar_lea.vmem [#allocation6], %s1736_s10  ;;  %s898_s2 = smul.u32 48, %s1400_s11 }
  0x5b   : > { %s245_s13 = sshll.u32 %s238_s12, 4  ;;  %s1466_s20 = scalar_lea.hbm %s1700_s4, %s1404_s28  ;;  %s1459_s13 = int_to_ptr.vmem [resolvable:$true] %s245_s13 }
  0x5c   : > { %s1248_s30 = smov [#allocation9]   ;;  %s259_s18 = scalar_lea.vmem [#allocation11], %s898_s2 }
  0x5d   : > { %s201_s25 = sshll.u32 %s1248_s30, 4  ;;  %s266_s6 = sshll.u32 %s259_s18, 4  ;;  %s202_s25 = int_to_ptr.vmem [resolvable:$true] %s201_s25  ;;  %s1468_s6 = int_to_ptr.vmem [resolvable:$true] %s266_s6 }
  0x5e   : > { %s1072_s27 = scalar_lea.hbm %s1699_s3, 2304  ;;  %p1737_p8 = scmp.ne.s32.totalorder %s1727_s29, 0 }
  0x5f   : > { %p1073_p4 = scmp.ne.s32.totalorder %s1699_s3, %s1072_s27  ;;  %p1079_p2 = scmp.lt.u32.totalorder %s1072_s27, %s1699_s3 }
  0x60   : > { %p1738_p11 = pneg %p1737_p8 }
  0x62   : > { %p1075_p13 = pnand %p1073_p4, %p1738_p11 }
  0x64   : > { %p1076_p7 = pneg %p1075_p13 }
  0x66   : > { %p1081_p3 = pnand %p1079_p2, %p1076_p7 }
  0x68   : > { %1084 = shalt.err (!%p1081_p3)
}
  0x69   : > { %s1085_s18 = scalar_lea.vmem %s202_s25, 2304  ;;  %p1739_p12 = pmov %p1738_p11 }
  0x6a   : > { %p1086_p5 = scmp.ne.s32.totalorder %s202_s25, %s1085_s18  ;;  %p1093_p10 = scmp.lt.s32.totalorder %s202_s25, %s202_s25 }
  0x6b   : > { %p1094_p9 = scmp.lt.s32.totalorder %s1085_s18, %s1085_s18 }
  0x6c   : > { %p1088_p1 = pnand %p1086_p5, %p1739_p12 }
  0x6d   : > { %p1095_p0 = por %p1094_p9, %p1093_p10 }
  0x6e   : > { %p1089_p6 = pneg %p1088_p1 }
  0x70   : > { %p1096_p4 = pnand %p1095_p0, %p1089_p6 }
  0x72   : > { %1099 = shalt.err (!%p1096_p4)
}
  0x73   : > { %s1249_s30 = smov 256   ;;  %s1250_s11 = smov 16  }
  0x74   : > { %922 = dma.hbm_to_vmem [thread:$0]  (!%p1737_p8), %s1699_s3, 2304, %s202_s25, [#allocation10], %s1249_s30, %s1249_s30, %s1250_s11  }
  0x75   : > { %s1740_s15 = sand.u32 1, %s1242_s21   ;;  %s1100_s27 = scalar_lea.hbm %s1455_s14, 512 }
  0x76   : > { %s1495_s17 = scalar_lea.sflag [#allocation7], %s1740_s15  ;;  %p1101_p9 = scmp.ne.s32.totalorder %s1455_s14, %s1100_s27 }
  0x77   : > { %p1741_p0 = scmp.ne.s32.totalorder %s1735_s7, 0  ;;  %s1105_s0 = scalar_lea.hbm %s1697_s1, 1024 }
  0x78   : > { %p1106_p7 = scmp.lt.u32.totalorder %s1455_s14, %s1697_s1  ;;  %p1107_p2 = scmp.lt.u32.totalorder %s1105_s0, %s1100_s27 }
  0x79   : > { %p1103_p11 = pnand %p1101_p9, %p1741_p0  ;;  %p1109_p5 = scmp.lt.u32.totalorder %s1100_s27, %s1455_s14 }
  0x7a   : > { %p1108_p3 = por %p1107_p2, %p1106_p7 }
  0x7b   : > { %p1104_p13 = pneg %p1103_p11 }
  0x7c   : > { %p1110_p8 = por %p1109_p5, %p1108_p3 }
  0x7e   : > { %p1111_p12 = pnand %p1110_p8, %p1104_p13 }
  0x80   : > { %1114 = shalt.err (!%p1111_p12)
}
  0x81   : > { %s1115_s25 = scalar_lea.vmem %s1459_s13, 512  ;;  %s1251_s18 = smov [#allocation6]  }
  0x82   : > { %p1116_p1 = scmp.ne.s32.totalorder %s1459_s13, %s1115_s25  ;;  %s1120_s28 = sshll.u32 %s1251_s18, 4  ;;  %s1121_s28 = int_to_ptr.vmem [resolvable:$false] %s1120_s28 }
  0x83   : > { %s1122_s2 = scalar_lea.vmem %s1121_s28, 1024  ;;  %p1123_p4 = scmp.lt.s32.totalorder %s1459_s13, %s1121_s28 }
  0x84   : > { %p1118_p6 = pnand %p1116_p1, %p1741_p0  ;;  %p1124_p9 = scmp.lt.s32.totalorder %s1122_s2, %s1115_s25 }
  0x86   : > { %p1119_p10 = pneg %p1118_p6  ;;  %p1125_p11 = por %p1124_p9, %p1123_p4 }
  0x88   : > { %p1126_p7 = pnand %p1125_p11, %p1119_p10 }
  0x8a   : > { %1129 = shalt.err (!%p1126_p7)
}
  0x8b   : > { %s1252_s15 = smov 512   ;;  %p1742_p13 = scmp.ne.s32.totalorder %s1734_s16, 0 }
  0x8c   : > { %s1130_s27 = scalar_lea.hbm %s1466_s20, 768  ;;  %s1135_s0 = scalar_lea.hbm %s1700_s4, 1536 }
  0x8d   : > { %929 = dma.hbm_to_vmem [thread:$0]  (!%p1742_p13), %s1455_s14, 512, %s1459_s13, %s1495_s17, %s1252_s15, %s1249_s30, %s1250_s11  }
  0x8e   : > { %p1131_p2 = scmp.ne.s32.totalorder %s1466_s20, %s1130_s27  ;;  %p1136_p8 = scmp.lt.u32.totalorder %s1466_s20, %s1700_s4 }
  0x8f   : > { %p1137_p12 = scmp.lt.u32.totalorder %s1135_s0, %s1130_s27  ;;  %p1139_p6 = scmp.lt.u32.totalorder %s1130_s27, %s1466_s20 }
  0x90   : > { %p1133_p3 = pnand %p1131_p2, %p1741_p0 }
  0x91   : > { %p1138_p1 = por %p1137_p12, %p1136_p8 }
  0x92   : > { %p1134_p5 = pneg %p1133_p3 }
  0x93   : > { %p1140_p10 = por %p1139_p6, %p1138_p1 }
  0x95   : > { %p1141_p4 = pnand %p1140_p10, %p1134_p5 }
  0x97   : > { %1144 = shalt.err (!%p1141_p4)
}
  0x98   : > { %s1145_s14 = scalar_lea.vmem %s1468_s6, 768  ;;  %s1253_s13 = smov [#allocation11]  }
  0x99   : > { %p1146_p9 = scmp.ne.s32.totalorder %s1468_s6, %s1145_s14  ;;  %s1150_s17 = sshll.u32 %s1253_s13, 4  ;;  %s1151_s17 = int_to_ptr.vmem [resolvable:$false] %s1150_s17 }
  0x9a   : > { %s1152_s25 = scalar_lea.vmem %s1151_s17, 1536  ;;  %p1153_p2 = scmp.lt.s32.totalorder %s1468_s6, %s1151_s17 }
  0x9b   : > { %p1148_p11 = pnand %p1146_p9, %p1741_p0  ;;  %p1154_p3 = scmp.lt.s32.totalorder %s1152_s25, %s1145_s14 }
  0x9d   : > { %p1149_p7 = pneg %p1148_p11  ;;  %p1155_p8 = por %p1154_p3, %p1153_p2 }
  0x9f   : > { %p1156_p12 = pnand %p1155_p8, %p1149_p7 }
  0xa1   : > { %1159 = shalt.err (!%p1156_p12)
}
  0xa2   : > { %932 = dma.hbm_to_vmem [thread:$0]  (!%p1742_p13), %s1466_s20, 768, %s1468_s6, %s1421_s23, %s1252_s15, %s1249_s30, %s1250_s11  }
  0xa3   : > { %p1743_p0 = scmp.ne.s32.totalorder %s1726_s26, 0 }
  0xa4   : > { %s280_s7 = sand.u32 (!%p1743_p0), 1, %s1318_s22   ;;  %s1551_s18 = sand.u32 (!%p1743_p0), 1, %s1234_s19  }
  0xa5   : > { %278 = sbr.rel (%p1743_p0) target bundleno = 610 (0x262), region = 40  ;;  %s852_s28 = sshll.u32 (!%p1743_p0), %s1551_s18, 4 }
  0xa6   : > { %s281_s2 = scalar_lea.sflag (!%p1743_p0), [#allocation4], %s280_s7  ;;  %s284_s16 = scalar_lea.vmem (!%p1743_p0), [#allocation3], %s852_s28 }
  0xa7   : > { %p1744_p5 = scmp.ne.s32.totalorder (!%p1743_p0), %s1723_s24, 0 }
  0xac   : > { %1205 = dma.done.wait (%p1744_p5), %s281_s2, 256  }
  0xad   : > { %1207 = vsyncadd (%p1744_p5), %s281_s2, 4294967040  ;;  %s853_s20 = sshll.u32 %s1551_s18, 5  ;;  %s290_s26 = scalar_lea.sflag [#allocation7], %s280_s7 }
  0xae   : > { %s1559_s23 = scalar_lea.vmem [#allocation6], %s853_s20 }
  0xaf   : > { %1209 = dma.done.wait (%p1744_p5), %s290_s26, 512  }
  0xb0   : > { %1211 = vsyncadd (%p1744_p5), %s290_s26, 4294966784  ;;  %p1745_p13 = scmp.eq.s32.totalorder %s1318_s22, 0 }
  0xb2   : > { %1213 = dma.done.wait (%p1745_p13), [#allocation7], 512   ;;  %p1746_p1 = pmov %p1745_p13 }
  0xb4   : > { %1215 = vsyncadd (%p1746_p1), [#allocation7], 4294966784  ;;  %p1747_p6 = pmov %p1746_p1 }
  0xb5   : > { %p1748_p10 = pmov %p1746_p1 }
  0xb6   : > { %1217 = dma.done.wait (%p1747_p6), [#allocation10], 2304  }
  0xb7   : > { %1219 = vsyncadd (%p1748_p10), [#allocation10], 4294964992  ;;  %s899_s6 = smul.u32 48, %s1551_s18 }
  0xb9   : > { %s1576_s30 = scalar_lea.vmem [#allocation11], %s899_s6 }
  0xba   : > { %1221 = dma.done.wait (%p1744_p5), %s281_s2, 768  }
  0xbb   : > { %1223 = vsyncadd (%p1744_p5), %s281_s2, 4294966528  ;;  %v1582_v0 = vld [vmem:[%s284_s16] sm:$0xff]  ;;  %s1254_s11 = smov 16   ;;  %s1255_s15 = smov 17   ;;  %v1587_v1 = vld [vmem:[%s284_s16 + $0x8] sm:$0xff]  ;;  %v1260_v2 = vmov 0.0   ;;  %v357_v3 = vlaneseq }
  0xbc   : > { %368 = vrot.lane.b32.xlu1 %v1582_v0, %s1254_s11  ;;  %353 = vrot.lane.b32.xlu0 %v1582_v0, %s1255_s15  ;;  %s1256_s27 = smov 15   ;;  %s1257_s24 = smov 1   ;;  %v375_v7 = vld [vmem:[#allocation9 + $0x10] sm:$0xff]  ;;  %v376_v8 = vld [vmem:[#allocation9 + $0x18] sm:$0xff]  ;;  %v362_v9 = vld [vmem:[#allocation9] sm:$0xff]  ;;  %vm491_vm8 = vcmask 654336  }
  0xbd   : > { %s1258_s10 = smov 127   ;;  %s1259_s12 = smov 113   ;;  %568 = vmatprep.mubr.f32.mxu0 %v1260_v2  ;;  %580 = vmatprep.mubr.f32.mxu1 %v1260_v2  ;;  %v1606_v4 = vand.u32 127, %v357_v3  ;;  %v363_v10 = vld [vmem:[#allocation9 + $0x8] sm:$0xff]  ;;  %v388_v25 = vld [vmem:[#allocation9 + $0x20] sm:$0xff]  ;;  %v401_v29 = vld [vmem:[#allocation9 + $0x30] sm:$0xff] }
  0xbe   : > { %s1261_s0 = smov 112   ;;  %s1262_s29 = smov 111   ;;  %v389_v26 = vld [vmem:[#allocation9 + $0x28] sm:$0xff]  ;;  %v402_v30 = vld [vmem:[#allocation9 + $0x38] sm:$0xff]  ;;  %v407_v36 = vld [vmem:[#allocation9 + $0x40] sm:$0xff] }
  0xbf   : > { %vm372_vm0 = vcmp.lt.s32.totalorder %v1606_v4, 16  ;;  %vm359_vm1 = vcmp.lt.s32.totalorder %v1606_v4, 17  ;;  %vm385_vm2 = vcmp.lt.s32.totalorder %v1606_v4, 15  ;;  %vm398_vm3 = vcmp.lt.s32.totalorder %v1606_v4, 1  ;;  %v408_v35 = vld [vmem:[#allocation9 + $0x48] sm:$0xff]  ;;  %v420_v41 = vld [vmem:[#allocation9 + $0x50] sm:$0xff] }
  0xc0   : > { %370 = vrot.lane.b32.xlu1 %v1587_v1, %s1254_s11  ;;  %355 = vrot.lane.b32.xlu0 %v1587_v1, %s1255_s15  ;;  %vm417_vm4 = vcmp.lt.s32.totalorder %v1606_v4, 127  ;;  %v421_v42 = vld [vmem:[#allocation9 + $0x58] sm:$0xff]  ;;  %v410_v47 = vmul.f32 %v408_v35, %v1587_v1  ;;  %v409_v48 = vmul.f32 %v407_v36, %v1582_v0  ;;  %vm430_vm5 = vcmp.lt.s32.totalorder %v1606_v4, 113  ;;  %v433_v57 = vld [vmem:[#allocation9 + $0x60] sm:$0xff]  ;;  %v434_v58 = vld [vmem:[#allocation9 + $0x68] sm:$0xff]  ;;  %s1634_s8 = scalar_lea.vmem [#allocation12], %s899_s6 }
  0xc1   : > { %vm443_vm6 = vcmp.lt.s32.totalorder %v1606_v4, 112  ;;  %v446_v61 = vld [vmem:[#allocation9 + $0x70] sm:$0xff]  ;;  %v447_v62 = vld [vmem:[#allocation9 + $0x78] sm:$0xff]  ;;  %vm456_vm7 = vcmp.lt.s32.totalorder %v1606_v4, 111  ;;  %s867_s14 = sshll.u32 %s1318_s22, 8  ;;  %s703_s13 = sshll.u32 %s1634_s8, 4  ;;  %s1649_s13 = int_to_ptr.vmem [resolvable:$true] %s703_s13 }
  0xc2   : > { %s1647_s7 = scalar_lea.hbm %s1701_s5, %s867_s14  ;;  %s690_s28 = scalar_lea.sflag [#allocation5], %s1551_s18 }
  0xc3   : > { %s1160_s2 = scalar_lea.vmem %s1649_s13, 768  ;;  %p1749_p9 = scmp.ne.s32.totalorder %s1732_s9, 0 }
  0xc4   : > { %383 = vrot.lane.b32.xlu1 %v1587_v1, %s1256_s27  ;;  %381 = vrot.lane.b32.xlu0 %v1582_v0, %s1256_s27  ;;  %p1161_p4 = scmp.ne.s32.totalorder %s1649_s13, %s1160_s2  ;;  %s1264_s22 = smov [#allocation12]  }
  0xc5   : > { %s1164_s16 = sshll.u32 %s1264_s22, 4  ;;  %s1165_s16 = int_to_ptr.vmem [resolvable:$false] %s1164_s16 }
  0xc6   : > { %p1162_p11 = pnand %p1161_p4, %p1749_p9  ;;  %s1166_s20 = scalar_lea.vmem %s1165_s16, 1536 }
  0xc7   : > { %p1167_p2 = scmp.lt.s32.totalorder %s1649_s13, %s1165_s16  ;;  %p1168_p3 = scmp.lt.s32.totalorder %s1166_s20, %s1160_s2 }
  0xc8   : > { %396 = vrot.lane.b32.xlu1 %v1587_v1, %s1257_s24  ;;  %394 = vrot.lane.b32.xlu0 %v1582_v0, %s1257_s24  ;;  %p1163_p7 = pneg %p1162_p11 }
  0xc9   : > { %p1169_p8 = por %p1168_p3, %p1167_p2 }
  0xcb   : > { %p1170_p12 = pnand %p1169_p8, %p1163_p7 }
  0xcc   : > { %415 = vrot.lane.b32.xlu1 %v1587_v1, %s1258_s10  ;;  %413 = vrot.lane.b32.xlu0 %v1582_v0, %s1258_s10 }
  0xd0   : > { %428 = vrot.lane.b32.xlu1 %v1587_v1, %s1259_s12  ;;  %426 = vrot.lane.b32.xlu0 %v1582_v0, %s1259_s12 }
  0xd4   : > { %441 = vrot.lane.b32.xlu1 %v1587_v1, %s1261_s0  ;;  %439 = vrot.lane.b32.xlu0 %v1582_v0, %s1261_s0 }
  0xd8   : > { %454 = vrot.lane.b32.xlu1 %v1587_v1, %s1262_s29  ;;  %452 = vrot.lane.b32.xlu0 %v1582_v0, %s1262_s29 }
 0x12e   : > { %v369_v5 = vpop.permute.xlu1 %368  ;;  %v354_v6 = vpop.permute.xlu0 %353 }
 0x132   : > { %v371_v11 = vpop.permute.xlu1 %370  ;;  %v356_v12 = vpop.permute.xlu0 %355 }
 0x133   : > { %v373_v13 = vsel %vm372_vm0, %v369_v5, %v371_v11  ;;  %v374_v14 = vsel %vm372_vm0, %v371_v11, %v369_v5  ;;  %v360_v15 = vsel %vm359_vm1, %v354_v6, %v356_v12  ;;  %v361_v16 = vsel %vm359_vm1, %v356_v12, %v354_v6 }
 0x134   : > { %v377_v17 = vmul.f32 %v375_v7, %v374_v14  ;;  %v378_v18 = vmul.f32 %v376_v8, %v373_v13  ;;  %v364_v19 = vmul.f32 %v362_v9, %v361_v16  ;;  %v365_v20 = vmul.f32 %v363_v10, %v360_v15  ;;  %v459_v9 = vld [vmem:[#allocation9 + $0x80] sm:$0xff]  ;;  %v460_v10 = vld [vmem:[#allocation9 + $0x88] sm:$0xff] }
 0x136   : > { %v384_v21 = vpop.permute.xlu1 %383  ;;  %v382_v22 = vpop.permute.xlu0 %381  ;;  %v868_v23 = vpack.c.bf16 %v378_v18, %v365_v20  ;;  %v870_v24 = vpack.c.bf16 %v377_v17, %v364_v19  ;;  %v1263_v19 = vmov 1.0  }
 0x137   : > { %v386_v27 = vsel %vm385_vm2, %v382_v22, %v384_v21  ;;  %v387_v28 = vsel %vm385_vm2, %v384_v21, %v382_v22  ;;  %v467_v21 = vld [vmem:[#allocation8] sm:$0xff]  ;;  %v469_v22 = vld [vmem:[#allocation8 + $0x10] sm:$0xff] }
 0x138   : > { %869 = vmatprep.subr.bf16.mxu0 %v868_v23  ;;  %888 = vmatprep.subr.bf16.mxu1 %v868_v23  ;;  %v390_v37 = vmul.f32 %v388_v25, %v387_v28  ;;  %v391_v38 = vmul.f32 %v389_v26, %v386_v27  ;;  %v468_v23 = vld [vmem:[#allocation8 + $0x8] sm:$0xff]  ;;  %v633_v25 = vld [vmem:[%s1576_s30] sm:$0xff] }
 0x139   : > { %871 = vmatpush1.bf16.msra.mxu0 %v870_v24  ;;  %893 = vmatpush1.bf16.msra.mxu1 %v870_v24  ;;  %v470_v24 = vld [vmem:[#allocation8 + $0x18] sm:$0xff]  ;;  %v637_v26 = vld [vmem:[%s1576_s30 + $0x20] sm:$0xff] }
 0x13a   : > { %v397_v31 = vpop.permute.xlu1 %396  ;;  %v395_v32 = vpop.permute.xlu0 %394  ;;  %v634_v27 = vld [vmem:[%s1576_s30 + $0x8] sm:$0xff] }
 0x13b   : > { %v399_v33 = vsel %vm398_vm3, %v395_v32, %v397_v31  ;;  %v400_v34 = vsel %vm398_vm3, %v397_v31, %v395_v32  ;;  %v638_v28 = vld [vmem:[%s1576_s30 + $0x28] sm:$0xff]  ;;  %v636_v32 = vld [vmem:[%s1576_s30 + $0x18] sm:$0xff] }
 0x13c   : > { %v403_v39 = vmul.f32 %v401_v29, %v400_v34  ;;  %v404_v40 = vmul.f32 %v402_v30, %v399_v33  ;;  %v639_v29 = vsub.f32 %v637_v26, %v633_v25  ;;  %v635_v30 = vld [vmem:[%s1576_s30 + $0x10] sm:$0xff]  ;;  %v640_v31 = vsub.f32 %v638_v28, %v634_v27 }
 0x13e   : > { %v416_v43 = vpop.permute.xlu1 %415  ;;  %v414_v44 = vpop.permute.xlu0 %413  ;;  %v872_v45 = vpack.c.bf16 %v404_v40, %v391_v38  ;;  %v874_v46 = vpack.c.bf16 %v403_v39, %v390_v37  ;;  %v641_v33 = vmul.f32 %v639_v29, %v635_v30  ;;  %v642_v34 = vmul.f32 %v640_v31, %v636_v32 }
 0x13f   : > { %v418_v49 = vsel %vm417_vm4, %v414_v44, %v416_v43  ;;  %v419_v50 = vsel %vm417_vm4, %v416_v43, %v414_v44 }
 0x140   : > { %v422_v51 = vmul.f32 %v420_v41, %v418_v49  ;;  %v423_v52 = vmul.f32 %v421_v42, %v419_v50  ;;  %873 = vmatprep.subr.bf16.mxu0 %v872_v45  ;;  %889 = vmatprep.subr.bf16.mxu1 %v872_v45  ;;  %v645_v35 = vceil.f32 %v641_v33  ;;  %v647_v36 = vfloor.f32 %v641_v33 }
 0x141   : > { %875 = vmatpush1.bf16.msra.mxu0 %v874_v46  ;;  %894 = vmatpush1.bf16.msra.mxu1 %v874_v46  ;;  %vm643_vm9 = vcmp.lt.f32.partialorder %v641_v33, 0.0  ;;  %v646_v37 = vceil.f32 %v642_v34  ;;  %v648_v38 = vfloor.f32 %v642_v34  ;;  %vm644_vm10 = vcmp.lt.f32.partialorder %v642_v34, 0.0 }
 0x142   : > { %v429_v53 = vpop.permute.xlu1 %428  ;;  %v427_v54 = vpop.permute.xlu0 %426  ;;  %v876_v55 = vpack.c.bf16 %v423_v52, %v410_v47  ;;  %v878_v56 = vpack.c.bf16 %v422_v51, %v409_v48 }
 0x143   : > { %v431_v59 = vsel %vm430_vm5, %v427_v54, %v429_v53  ;;  %v432_v60 = vsel %vm430_vm5, %v429_v53, %v427_v54  ;;  %v650_v39 = vsel %vm644_vm10, %v646_v37, %v648_v38 }
 0x144   : > { %877 = vmatprep.subr.bf16.mxu0 %v876_v55  ;;  %890 = vmatprep.subr.bf16.mxu1 %v876_v55  ;;  %v435_v5 = vmul.f32 %v433_v57, %v431_v59  ;;  %v436_v6 = vmul.f32 %v434_v58, %v432_v60  ;;  %v652_v41 = vsub.f32 %v642_v34, %v650_v39 }
 0x145   : > { %879 = vmatpush1.bf16.msra.mxu0 %v878_v56  ;;  %895 = vmatpush1.bf16.msra.mxu1 %v878_v56 }
 0x146   : > { %v442_v63 = vpop.permute.xlu1 %441  ;;  %v440_v0 = vpop.permute.xlu0 %439  ;;  %v654_v49 = vand.u32 2147483647, %v652_v41 }
 0x147   : > { %v444_v1 = vsel %vm443_vm6, %v440_v0, %v442_v63  ;;  %v445_v3 = vsel %vm443_vm6, %v442_v63, %v440_v0 }
 0x148   : > { %v448_v7 = vmul.f32 %v446_v61, %v444_v1  ;;  %v449_v8 = vmul.f32 %v447_v62, %v445_v3  ;;  %v656_v57 = vmul.f32 20.0, %v654_v49  ;;  %v660_v61 = vmul.f32 0.001, %v654_v49 }
 0x149   : > { %vm662_vm12 = vcmp.lt.f32.partialorder %v654_v49, 0.1  ;;  %vm666_vm14 = vcmp.lt.f32.partialorder %v654_v49, 0.05 }
 0x14a   : > { %v455_v11 = vpop.permute.xlu1 %454  ;;  %v453_v12 = vpop.permute.xlu0 %452  ;;  %v880_v13 = vpack.c.bf16 %v449_v8, %v436_v6  ;;  %v882_v14 = vpack.c.bf16 %v448_v7, %v435_v5  ;;  %v658_v60 = vsub.f32 2.0, %v656_v57 }
 0x14b   : > { %v457_v15 = vsel %vm456_vm7, %v453_v12, %v455_v11  ;;  %v458_v16 = vsel %vm456_vm7, %v455_v11, %v453_v12 }
 0x14c   : > { %v461_v17 = vmul.f32 %v459_v9, %v457_v15  ;;  %v462_v18 = vmul.f32 %v460_v10, %v458_v16  ;;  %881 = vmatprep.subr.bf16.mxu0 %v880_v13  ;;  %891 = vmatprep.subr.bf16.mxu1 %v880_v13  ;;  %v664_v6 = vsel %vm662_vm12, %v658_v60, %v660_v61  ;;  %v619_v16 = vld [vmem:[%s1559_s23] sm:$0xff] }
 0x14d   : > { %883 = vmatpush1.bf16.msra.mxu0 %v882_v14  ;;  %896 = vmatpush1.bf16.msra.mxu1 %v882_v14  ;;  %v668_v14 = vsel %vm666_vm14, %v656_v57, %v664_v6 }
 0x14e   : > { %v884_v4 = vpack.c.bf16 %v1263_v19, %v462_v18  ;;  %v886_v20 = vpack.c.bf16 %v1263_v19, %v461_v17 }
 0x150   : > { %885 = vmatprep.subr.bf16.mxu0 %v884_v4  ;;  %892 = vmatprep.subr.bf16.mxu1 %v884_v4 }
 0x151   : > { %887 = vmatpush1.bf16.msra.mxu0 %v886_v20  ;;  %897 = vmatpush1.bf16.msra.mxu1 %v886_v20  ;;  %v620_v20 = vld [vmem:[%s1559_s23 + $0x8] sm:$0xff] }
 0x154   : > { %856 = vmatmul.mubr.msk.f32.vlgmr.msra.gmra.mrb[0].mxu0 %vm491_vm8, %v467_v21  ;;  %858 = vmatmul.mubr.msk.f32.vlgmr.msra.gmra.mrb[0].mxu1 %vm491_vm8, %v469_v22 }
 0x155   : > { %574 = vmatprep.mubr.f32.mxu0 %v1260_v2  ;;  %586 = vmatprep.mubr.f32.mxu1 %v1260_v2  ;;  %v649_v2 = vsel %vm643_vm9, %v645_v35, %v647_v36 }
 0x156   : > { %v651_v40 = vsub.f32 %v641_v33, %v649_v2  ;;  %v621_v2 = vld [vmem:[%s1559_s23 + $0x10] sm:$0xff] }
 0x158   : > { %857 = vmatmul.mubr.msk.f32.gmra.mrb[2].mxu0 %vm491_vm8, %v468_v23  ;;  %859 = vmatmul.mubr.msk.f32.gmra.mrb[2].mxu1 %vm491_vm8, %v470_v24  ;;  %v653_v48 = vand.u32 2147483647, %v651_v40  ;;  %v670_v23 = vsub.f32 1.0, %v668_v14  ;;  %v622_v40 = vld [vmem:[%s1559_s23 + $0x18] sm:$0xff] }
 0x15a   : > { %v655_v55 = vmul.f32 20.0, %v653_v48  ;;  %v659_v59 = vmul.f32 0.001, %v653_v48  ;;  %vm661_vm11 = vcmp.lt.f32.partialorder %v653_v48, 0.1  ;;  %v676_v29 = vmul.f32 %v670_v23, %v620_v20 }
 0x15b   : > { %vm665_vm13 = vcmp.lt.f32.partialorder %v653_v48, 0.05 }
 0x15c   : > { %v657_v58 = vsub.f32 2.0, %v655_v55 }
 0x15e   : > { %v663_v1 = vsel %vm661_vm11, %v657_v58, %v659_v59 }
 0x15f   : > { %v667_v11 = vsel %vm665_vm13, %v655_v55, %v663_v1 }
 0x160   : > { %v669_v4 = vsub.f32 1.0, %v667_v11 }
 0x162   : > { %v675_v27 = vmul.f32 %v669_v4, %v619_v16 }
 0x227   : > { %v570_v42 = vpop.f32.mrb[0].mxu0  ;;  %v582_v43 = vpop.f32.mrb[0].mxu1 }
 0x228   : > { %v593_v44 = vmul.f32 0.5, %v570_v42  ;;  %v572_v45 = vpop.f32.mrb[1].mxu0  ;;  %v584_v46 = vpop.f32.mrb[1].mxu1  ;;  %v609_v3 = vmul.f32 0.5, %v582_v43 }
 0x229   : > { %v594_v47 = vmul.f32 0.5, %v572_v45  ;;  %v610_v7 = vmul.f32 0.5, %v584_v46  ;;  %v684_v46 = vmul.f32 %v670_v23, %v622_v40 }
 0x22a   : > { %994 = vtanh.f32 %v593_v44  ;;  %v683_v44 = vmul.f32 %v669_v4, %v621_v2 }
 0x22b   : > { %996 = vtanh.f32 %v594_v47  ;;  %v576_v50 = vpop.f32.mrb[2].mxu0  ;;  %v588_v51 = vpop.f32.mrb[2].mxu1 }
 0x22c   : > { %v601_v52 = vmul.f32 0.5, %v576_v50  ;;  %v578_v53 = vpop.f32.mrb[3].mxu0  ;;  %v590_v54 = vpop.f32.mrb[3].mxu1 }
 0x22d   : > { %v602_v56 = vmul.f32 0.5, %v578_v53 }
 0x22e   : > { %998 = vtanh.f32 %v601_v52 }
 0x22f   : > { %1000 = vtanh.f32 %v602_v56 }
 0x230   : > { %1002 = vtanh.f32 %v588_v51 }
 0x231   : > { %1004 = vtanh.f32 %v590_v54 }
 0x232   : > { %1006 = vtanh.f32 %v609_v3 }
 0x233   : > { %1008 = vtanh.f32 %v610_v7 }
 0x234   : > { %v995_v62 = vpop.eup %994 }
 0x235   : > { %v997_v63 = vpop.eup %996  ;;  %v597_v0 = vadd.f32 1.0, %v995_v62 }
 0x236   : > { %v598_v5 = vadd.f32 1.0, %v997_v63 }
 0x237   : > { %v599_v8 = vmul.f32 0.5, %v597_v0 }
 0x238   : > { %v999_v9 = vpop.eup %998  ;;  %v600_v10 = vmul.f32 0.5, %v598_v5 }
 0x239   : > { %v1001_v12 = vpop.eup %1000  ;;  %v605_v13 = vadd.f32 1.0, %v999_v9 }
 0x23a   : > { %v1003_v15 = vpop.eup %1002  ;;  %v606_v17 = vadd.f32 1.0, %v1001_v12 }
 0x23b   : > { %v1005_v18 = vpop.eup %1004  ;;  %v607_v19 = vmul.f32 0.5, %v605_v13  ;;  %v625_v21 = vmul.f32 %v1003_v15, %v599_v8 }
 0x23c   : > { %v608_v22 = vmul.f32 0.5, %v606_v17  ;;  %v626_v24 = vmul.f32 %v1005_v18, %v600_v10  ;;  %v1007_v33 = vpop.eup %1006 }
 0x23d   : > { %v623_v25 = vmul.f32 %v619_v16, %v607_v19  ;;  %v1009_v35 = vpop.eup %1008  ;;  %v613_v37 = vadd.f32 1.0, %v1007_v33 }
 0x23e   : > { %v624_v26 = vmul.f32 %v620_v20, %v608_v22  ;;  %v614_v38 = vadd.f32 1.0, %v1009_v35 }
 0x23f   : > { %v627_v28 = vadd.f32 %v625_v21, %v623_v25  ;;  %v615_v39 = vmul.f32 0.5, %v613_v37 }
 0x240   : > { %v628_v30 = vadd.f32 %v626_v24, %v624_v26  ;;  %v616_v42 = vmul.f32 0.5, %v614_v38 }
 0x241   : > { %1010 = vtanh.f32 %v627_v28  ;;  %671 = vst [vmem:[%s1634_s8] sm:$0xff] %v627_v28  ;;  %v673_v31 = vmul.f32 %v667_v11, %v627_v28 }
 0x242   : > { %1012 = vtanh.f32 %v628_v30  ;;  %672 = vst [vmem:[%s1634_s8 + $0x8] sm:$0xff] %v628_v30  ;;  %v674_v32 = vmul.f32 %v668_v14, %v628_v30 }
 0x243   : > { %v677_v34 = vadd.f32 %v675_v27, %v673_v31 }
 0x244   : > { %v678_v36 = vadd.f32 %v676_v29, %v674_v32 }
 0x245   : > { %679 = vst [vmem:[%s1634_s8 + $0x10] sm:$0xff] %v677_v34 }
 0x246   : > { %680 = vst [vmem:[%s1634_s8 + $0x18] sm:$0xff] %v678_v36 }
 0x24b   : > { %v1011_v41 = vpop.eup %1010 }
 0x24c   : > { %v1013_v43 = vpop.eup %1012  ;;  %v631_v45 = vmul.f32 %v1011_v41, %v615_v39 }
 0x24d   : > { %v632_v47 = vmul.f32 %v1013_v43, %v616_v42 }
 0x24e   : > { %v681_v48 = vmul.f32 %v667_v11, %v631_v45 }
 0x24f   : > { %v682_v49 = vmul.f32 %v668_v14, %v632_v47 }
 0x250   : > { %v685_v50 = vadd.f32 %v683_v44, %v681_v48 }
 0x251   : > { %v686_v51 = vadd.f32 %v684_v46, %v682_v49 }
 0x252   : > { %687 = vst [vmem:[%s1634_s8 + $0x20] sm:$0xff] %v685_v50 }
 0x253   : > { %688 = vst [vmem:[%s1634_s8 + $0x28] sm:$0xff] %v686_v51 }
 0x254   : > { %1173 = shalt.err (!%p1170_p12)
}
 0x255   : > { %s1174_s26 = scalar_lea.hbm %s1647_s7, 768  ;;  %s1178_s30 = scalar_lea.hbm %s1701_s5, 1536 }
 0x256   : > { %p1175_p0 = scmp.ne.s32.totalorder %s1647_s7, %s1174_s26  ;;  %p1179_p1 = scmp.lt.u32.totalorder %s1647_s7, %s1701_s5 }
 0x257   : > { %p1180_p6 = scmp.lt.u32.totalorder %s1178_s30, %s1174_s26  ;;  %p1182_p4 = scmp.lt.u32.totalorder %s1174_s26, %s1647_s7 }
 0x258   : > { %p1176_p5 = pnand %p1175_p0, %p1749_p9 }
 0x259   : > { %p1181_p10 = por %p1180_p6, %p1179_p1 }
 0x25a   : > { %p1177_p13 = pneg %p1176_p5 }
 0x25b   : > { %p1183_p11 = por %p1182_p4, %p1181_p10 }
 0x25d   : > { %p1184_p7 = pnand %p1183_p11, %p1177_p13 }
 0x25f   : > { %1187 = shalt.err (!%p1184_p7)
}
 0x260   : > { %s1265_s24 = smov 256   ;;  %s1266_s10 = smov 512  }
 0x261   : > { %914 = dma.vmem_to_hbm [thread:$0]  (%p1749_p9), %s1649_s13, 768, %s1647_s7, %s690_s28, %s1265_s24, %s1266_s10, %s1254_s11  }
 0x262 PF: > { %s1750_s12 = sld [smem:[#allocation19_spill]]  ;;  %s1751_s0 = sld [smem:[#allocation21_spill]] }
 0x263   : > { %p1753_p3 = scmp.ge.s32.totalorder %s1242_s21, 2 }
 0x268   : > { %s718_s29 = sand.u32 1, %s1750_s12   ;;  %p1752_p2 = scmp.ne.s32.totalorder %s1751_s0, 0 }
 0x269   : > { %s719_s8 = scalar_lea.sflag [#allocation5], %s718_s29 }
 0x26a   : > { %p934_p8 = pnand %p1753_p3, %p1752_p2 }
 0x26c   : > { %1225 = dma.done.wait (!%p934_p8), %s719_s8, 768  }
 0x26d   : > { %1227 = vsyncadd (!%p934_p8), %s719_s8, 4294966528  ;;  %s1754_s21 = sld [smem:[#allocation22_spill]]  ;;  %s1755_s14 = sld [smem:[#allocation20_spill]] }
 0x26e   : > { %s1756_s20 = sld [smem:[#allocation23_spill]]  ;;  %s1757_s18 = smov %s1234_s19 }
 0x273   : > { %p22_p12 = scmp.ge.s32.totalorder %s1754_s21, 4   ;;  %s1758_s19 = smov %s1755_s14 }
 0x275   :  { %24 = sbr.rel (!%p22_p12) target bundleno = 11 (0xb), region = 117 }
 0x27c   :  { %724 = vsyncpa [#allocation4], 1 }
 0x27d   :  { %726 = vsyncpa [#allocation4 + $0x1], 1 }
 0x27e   :  { %727 = vsyncpa [#allocation7], 1 }
 0x27f   :  { %729 = vsyncpa [#allocation7 + $0x1], 1 }
 0x280   :  { %730 = vsyncpa [#allocation10], 1 }
 0x281   :  { %731 = vsyncpa [#allocation5], 1 }
 0x282   :  { %733 = vsyncpa [#allocation5 + $0x1], 1 }

</bundles_post_ra>
